<compile_context>
chip_gen: v7x
topology: tpu7x:2x2x1
jax: 0.10.0
libtpu: 0.0.40
codegen_flags: <defaults>
</compile_context>

<pallas_src>
import functools
import numpy as np
import jax
import jax.numpy as jnp
from jax.experimental import pallas as pl
from jax.experimental.pallas import tpu as pltpu


# ----------------------------------------------------------------------------
# Pallas kernel: inside-indicator + masked feature/count accumulation
# ----------------------------------------------------------------------------
def _roi_cut_kernel(coords_t_ref, start_ref, stop_ref, feat_ref,
                    inside_ref, boxsum_ref):
    n = pl.program_id(1)                     # reduction step within this split

    @pl.when(n == 0)
    def _():
        boxsum_ref[...] = jnp.zeros_like(boxsum_ref)

    dp = coords_t_ref.shape[0]               # D + 1 (static)

    # is_inside[b, c] = all_d (start[b, d] <= coord[c, d] < stop[b, d])
    c0 = coords_t_ref[0:1, :]                                # [1, TN]  (lanes)
    inside = (start_ref[:, 0:1] <= c0) & (c0 < stop_ref[:, 0:1])
    for d in range(1, dp):                                   # static unroll
        c_d = coords_t_ref[d:d + 1, :]                       # [1, TN]
        inside &= (start_ref[:, d:d + 1] <= c_d) & (c_d < stop_ref[:, d:d + 1])

    # int8 mask writeback (4x less HBM traffic than int32)
    inside_ref[...] = inside.astype(jnp.int8)

    # Masked feature + count accumulation (MXU, bf16 operands, f32 accumulate).
    # feat_ref carries a "ones" column -> the count lands in the accumulator.
    inside_m = inside.astype(feat_ref.dtype)
    boxsum_ref[...] += jnp.dot(inside_m, feat_ref[...],
                               preferred_element_type=jnp.float32)


@functools.partial(jax.jit, static_argnames=("tn", "num_splits"))
def _roi_cut_pallas_padded(coords_t, start, stop, features, *, tn, num_splits):
    """coords_t: [Dp, Np]  start/stop: [NBp, Dp]  features: [Np, Cp] (padded)."""
    dp, n_pad = coords_t.shape
    nb_pad = start.shape[0]
    c_pad = features.shape[1]
    n_tiles = n_pad // tn
    npers = n_tiles // num_splits            # tiles per split (static)
    grid = (num_splits, npers)               # reduction axis last

    inside_i8, box_sum_parts = pl.pallas_call(
        _roi_cut_kernel,
        out_shape=(
            jax.ShapeDtypeStruct((nb_pad, n_pad), jnp.int8),
            jax.ShapeDtypeStruct((num_splits, nb_pad, c_pad), jnp.float32),
        ),
        grid=grid,
        in_specs=[
            pl.BlockSpec((dp, tn), lambda s, n: (0, s * npers + n)),     # coords
            pl.BlockSpec((nb_pad, dp), lambda s, n: (0, 0)),             # starts
            pl.BlockSpec((nb_pad, dp), lambda s, n: (0, 0)),             # stops
            pl.BlockSpec((tn, c_pad), lambda s, n: (s * npers + n, 0)),  # feats
        ],
        out_specs=(
            pl.BlockSpec((nb_pad, tn), lambda s, n: (0, s * npers + n)),  # mask
            pl.BlockSpec((None, nb_pad, c_pad), lambda s, n: (s, 0, 0)),  # sums
        ),
        compiler_params=pltpu.CompilerParams(
            dimension_semantics=("parallel", "arbitrary"),
            vmem_limit_bytes=32 * 1024 * 1024),
    )(coords_t, start, stop, features)
    return inside_i8, box_sum_parts


def roi_cut_pallas(coords, features, bbox_tensor, bbox_sample_association,
                   *, tn=512, num_splits=2, feat_dtype=jnp.bfloat16):
    """Pallas-backed roi_cut core.

    coords:  [N, D+1] float32, last column = sample (batch) index
    features:[N, C]   float32
    bbox_tensor: [NB, 2, D] float32 (start / stop per dim)
    bbox_sample_association: [NB] int

    Returns (is_inside [NB, N] bool, box_features [NB, C] mean-pooled).
    """
    n, dp = coords.shape
    nb, _, d = bbox_tensor.shape
    c = features.shape[1]
    assert dp == d + 1

    assoc = bbox_sample_association.astype(bbox_tensor.dtype)
    start = jnp.concatenate([bbox_tensor[:, 0, :], assoc[:, None]], axis=-1)
    stop = jnp.concatenate([bbox_tensor[:, 1, :], assoc[:, None] + 1.0], axis=-1)

    chunk = tn * num_splits
    n_pad = pl.cdiv(n, chunk) * chunk
    nb_pad = max(pl.cdiv(nb, 32) * 32, 32)          # int8 mask: sublane mult of 32
    c_pad = max(pl.cdiv(c + 1, 128) * 128, 128)     # +1 count column, lane-dense

    # Padding: coords -> -1e30 sentinel (never inside any realistic box),
    # boxes -> degenerate [0, 0); padded feature rows are all-zero (count col
    # is only set for real rows, so padded coords never pollute sums/counts).
    coords_p = jnp.full((n_pad, dp), -1e30, jnp.float32)
    coords_p = coords_p.at[:n].set(coords.astype(jnp.float32))
    feats_p = jnp.zeros((n_pad, c_pad), feat_dtype)
    feats_p = feats_p.at[:n, :c].set(features.astype(feat_dtype))
    feats_p = feats_p.at[:n, c].set(1.0)            # count column (real rows only)
    start_p = jnp.zeros((nb_pad, dp), jnp.float32).at[:nb].set(start)
    stop_p = jnp.zeros((nb_pad, dp), jnp.float32).at[:nb].set(stop)

    inside_i8, box_sum_parts = _roi_cut_pallas_padded(
        coords_p.T, start_p, stop_p, feats_p, tn=tn, num_splits=num_splits)

    box_sum = jnp.sum(box_sum_parts, axis=0)        # split-K combine (tiny)
    counts = box_sum[:nb, c]
    box_features = box_sum[:nb, :c] / jnp.maximum(counts, 1.0)[:, None]
    is_inside = inside_i8[:nb, :n] != 0
    return is_inside, box_features


# ----------------------------------------------------------------------------
# Glue reproducing the variable-length selections of the PyTorch roi_cut
# (data-dependent boolean gather -> done eagerly; no static-shape kernel form).
# ----------------------------------------------------------------------------
def select_coords(coords, is_inside):
    rows, cols = jnp.nonzero(is_inside)                      # eager only
    selected_coords = coords[cols, :-1]
    return jnp.concatenate(
        [selected_coords, rows[:, None].astype(coords.dtype)], axis=-1)


def select_features(features, is_inside):
    if is_inside.shape[0] == 0:
        return jnp.zeros_like(features[:0])
    _, cols = jnp.nonzero(is_inside)
    return features[cols]


# ----------------------------------------------------------------------------
# Synthetic dependencies of SparseRoiCut
# ----------------------------------------------------------------------------
class BBoxTransformerSlice:
    """Scales normalized [0,1] boxes to the spatial grid (optionally clipped)."""

    def __init__(self, clip=False, resize=None):
        self.clip = clip
        self.resize = resize

    def __call__(self, bbox_batch, spatial_size):
        spatial = jnp.asarray(spatial_size, jnp.float32)
        if self.resize is not None:
            spatial = spatial * jnp.asarray(self.resize, jnp.float32)
        boxes, assoc, counts = [], [], []
        for b, bx in enumerate(bbox_batch):
            scaled = bx * spatial                               # [n_b, 2, D]
            if self.clip:
                scaled = jnp.clip(scaled, 0.0, spatial)
            boxes.append(scaled)
            assoc.append(jnp.full((bx.shape[0],), b, jnp.int32))
            counts.append(bx.shape[0])
        bbox_tensor = jnp.concatenate(boxes, axis=0)
        bbox_sample_association = jnp.concatenate(assoc, axis=0)
        bbox_sample_count = jnp.asarray(counts, jnp.int32)
        return bbox_tensor, bbox_sample_count, bbox_sample_association


class DenseToSparseExtractorCombiner:
    """Synthetic feature_extractor_combiner: every spatial site is active."""

    def extract(self, feature_map):
        # feature_map: NCHW [B, C, H, W]
        b, c, h, w = feature_map.shape
        hh, ww = jnp.meshgrid(jnp.arange(h), jnp.arange(w), indexing="ij")
        coords_hw = jnp.stack([hh.ravel(), ww.ravel()], axis=-1)          # [H*W, 2]
        coords = jnp.concatenate(
            [jnp.tile(coords_hw, (b, 1)),
             jnp.repeat(jnp.arange(b), h * w)[:, None]],
            axis=-1).astype(jnp.float32)                                  # [B*H*W, 3]
        features = jnp.transpose(feature_map, (0, 2, 3, 1)).reshape(b * h * w, c)
        spatial_size = (h, w)
        batch_splits = jnp.full((b,), h * w, jnp.int32)
        return coords, features, spatial_size, batch_splits

    # combine(): realised inside the Pallas kernel as masked mean pooling
    # (mask @ features / count) per box.
    # TODO(synk): the real feature_extractor_combiner.combine is an external,
    # unspecified module; a masked mean-pool stand-in is used here.


class SparseRoiCut:
    def __init__(self, feature_extractor_combiner, clip_boxes=False, resize_boxes=None):
        self.bbox_transformer = BBoxTransformerSlice(clip=clip_boxes, resize=resize_boxes)
        self.feature_extractor_combiner = feature_extractor_combiner

    def forward(self, feature_map, bbox_batch):
        old_coords, old_features, spatial_size, batch_splits = \
            self.feature_extractor_combiner.extract(feature_map)
        bbox_tensor, bbox_sample_count, bbox_sample_association = \
            self.bbox_transformer(bbox_batch, spatial_size)

        # Pallas hot path: inside-indicator + masked feature pooling (+counts)
        is_inside, box_features = roi_cut_pallas(
            old_coords, old_features, bbox_tensor, bbox_sample_association)

        # Variable-length selections (kept for parity with the PyTorch roi_cut)
        _new_coords = select_coords(old_coords, is_inside)
        _new_features = select_features(old_features, is_inside)

        return box_features, (is_inside, bbox_sample_count, batch_splits)


# ----------------------------------------------------------------------------
# Pure-numpy reference of get_inside_indicator (for correctness check)
# ----------------------------------------------------------------------------
def _ref_is_inside(coords, bbox_tensor, assoc):
    ext_assoc = np.stack([assoc, assoc + 1], -1)[..., None].astype(bbox_tensor.dtype)
    extended = np.concatenate([bbox_tensor, ext_assoc], -1)      # [NB, 2, D+1]
    start = extended[:, None, 0, :]
    stop = extended[:, None, 1, :]
    return ((start <= coords[None]) & (coords[None] < stop)).all(-1)


if __name__ == "__main__":
    key = jax.random.PRNGKey(0)
    k_fm, k_lo, k_sz = jax.random.split(key, 3)

    B, C, H, W = 2, 8, 16, 16
    feature_map = jax.random.normal(k_fm, (B, C, H, W), jnp.float32)

    # Normalized boxes: 3 for sample 0, 2 for sample 1 (total NB = 5)
    NB_total = 5
    lo = jax.random.uniform(k_lo, (NB_total, 2), minval=0.0, maxval=0.5)
    sz = jax.random.uniform(k_sz, (NB_total, 2), minval=0.2, maxval=0.45)
    boxes_norm = jnp.stack([lo, lo + sz], axis=1)                # [NB, 2, 2]
    bbox_batch = [boxes_norm[:3], boxes_norm[3:]]

    module = SparseRoiCut(DenseToSparseExtractorCombiner(), clip_boxes=True)
    box_features, (is_inside, bbox_sample_count, batch_splits) = \
        module.forward(feature_map, bbox_batch)
    jax.block_until_ready((box_features, is_inside))

    # --- correctness check against a plain numpy reference ---
    extractor = module.feature_extractor_combiner
    coords, feats, spatial_size, _ = extractor.extract(feature_map)
    bbox_tensor, _, assoc = module.bbox_transformer(bbox_batch, spatial_size)

    ref_mask = _ref_is_inside(np.asarray(coords), np.asarray(bbox_tensor),
                              np.asarray(assoc).astype(np.float32))
    np.testing.assert_array_equal(np.asarray(is_inside), ref_mask)

    # Kernel pools bf16-cast features (MXU operands), so the reference does too.
    feats_bf = np.asarray(feats.astype(jnp.bfloat16).astype(jnp.float32))
    mask_f = ref_mask.astype(np.float32)
    ref_box_feats = (mask_f @ feats_bf) / \
        np.maximum(mask_f.sum(1, keepdims=True), 1.0)
    np.testing.assert_allclose(np.asarray(box_features), ref_box_feats,
                               rtol=1e-4, atol=1e-5)

    print("KERNEL_OK")
</pallas_src>

<mosaic_0001>
module attributes {stable_mosaic.version = 11 : i64} {
  func.func @_roi_cut_kernel(%arg0: i32, %arg1: i32, %arg2: memref<3x512xf32, #tpu.memory_space<vmem>>, %arg3: memref<32x3xf32, #tpu.memory_space<vmem>>, %arg4: memref<32x3xf32, #tpu.memory_space<vmem>>, %arg5: memref<512x128xbf16, #tpu.memory_space<vmem>>, %arg6: memref<32x512xi8, #tpu.memory_space<vmem>>, %arg7: memref<1x32x128xf32, #tpu.memory_space<vmem>>) attributes {dimension_semantics = [#tpu.dimension_semantics<parallel>, #tpu.dimension_semantics<arbitrary>], iteration_bounds = array<i64: 2, 1>, scalar_prefetch = 0 : i64, scratch_operands = 0 : i64, tpu.core_type = #tpu.core_type<tc>, window_params = [{transform_indices = @transform_0, window_bounds = array<i64: 3, 512>}, {pipeline_mode = #tpu.pipeline_mode<synchronous>, transform_indices = @transform_1, window_bounds = array<i64: 32, 3>}, {pipeline_mode = #tpu.pipeline_mode<synchronous>, transform_indices = @transform_2, window_bounds = array<i64: 32, 3>}, {transform_indices = @transform_3, window_bounds = array<i64: 512, 128>}, {transform_indices = @transform_4, window_bounds = array<i64: 32, 512>}, {transform_indices = @transform_5, window_bounds = array<i64: 1, 32, 128>}]} {
    %c0_i32 = arith.constant 0 : i32
    %0 = arith.cmpi eq, %arg1, %c0_i32 : i32
    %1 = arith.extui %0 : i1 to i32
    %c0_i32_0 = arith.constant 0 : i32
    %2 = arith.cmpi ne, %1, %c0_i32_0 : i32
    scf.if %2 {
      %cst_26 = arith.constant 0.000000e+00 : f32
      %48 = vector.broadcast %cst_26 : f32 to vector<32x128xf32>
      %c0_27 = arith.constant 0 : index
      %c0_28 = arith.constant 0 : index
      %c0_29 = arith.constant 0 : index
      %49 = vector.load %arg7[%c0_27, %c0_28, %c0_29] : memref<1x32x128xf32, #tpu.memory_space<vmem>>, vector<1x32x128xf32>
      %50 = vector.shape_cast %49 : vector<1x32x128xf32> to vector<32x128xf32>
      %51 = vector.shape_cast %48 : vector<32x128xf32> to vector<1x32x128xf32>
      tpu.vector_store %arg7[%c0_27, %c0_28, %c0_29], %51 {strides = array<i32>} : memref<1x32x128xf32, #tpu.memory_space<vmem>>, vector<1x32x128xf32>,
    } else {
    }
    %c0 = arith.constant 0 : index
    %c0_1 = arith.constant 0 : index
    %3 = vector.load %arg2[%c0, %c0_1] : memref<3x512xf32, #tpu.memory_space<vmem>>, vector<1x512xf32>
    %c0_2 = arith.constant 0 : index
    %c0_3 = arith.constant 0 : index
    %4 = vector.load %arg3[%c0_2, %c0_3] : memref<32x3xf32, #tpu.memory_space<vmem>>, vector<32x1xf32>
    %5 = vector.broadcast %4 : vector<32x1xf32> to vector<32x512xf32>
    %6 = vector.broadcast %3 : vector<1x512xf32> to vector<32x512xf32>
    %7 = arith.cmpf ole, %5, %6 : vector<32x512xf32>
    %c0_4 = arith.constant 0 : index
    %c0_5 = arith.constant 0 : index
    %8 = vector.load %arg4[%c0_4, %c0_5] : memref<32x3xf32, #tpu.memory_space<vmem>>, vector<32x1xf32>
    %9 = vector.broadcast %3 : vector<1x512xf32> to vector<32x512xf32>
    %10 = vector.broadcast %8 : vector<32x1xf32> to vector<32x512xf32>
    %11 = arith.cmpf olt, %9, %10 : vector<32x512xf32>
    %12 = arith.andi %7, %11 : vector<32x512xi1>
    %c1 = arith.constant 1 : index
    %c0_6 = arith.constant 0 : index
    %13 = vector.load %arg2[%c1, %c0_6] : memref<3x512xf32, #tpu.memory_space<vmem>>, vector<1x512xf32>
    %c0_7 = arith.constant 0 : index
    %c1_8 = arith.constant 1 : index
    %14 = vector.load %arg3[%c0_7, %c1_8] : memref<32x3xf32, #tpu.memory_space<vmem>>, vector<32x1xf32>
    %15 = vector.broadcast %14 : vector<32x1xf32> to vector<32x512xf32>
    %16 = vector.broadcast %13 : vector<1x512xf32> to vector<32x512xf32>
    %17 = arith.cmpf ole, %15, %16 : vector<32x512xf32>
    %c0_9 = arith.constant 0 : index
    %c1_10 = arith.constant 1 : index
    %18 = vector.load %arg4[%c0_9, %c1_10] : memref<32x3xf32, #tpu.memory_space<vmem>>, vector<32x1xf32>
    %19 = vector.broadcast %13 : vector<1x512xf32> to vector<32x512xf32>
    %20 = vector.broadcast %18 : vector<32x1xf32> to vector<32x512xf32>
    %21 = arith.cmpf olt, %19, %20 : vector<32x512xf32>
    %22 = arith.andi %17, %21 : vector<32x512xi1>
    %23 = arith.andi %12, %22 : vector<32x512xi1>
    %c2 = arith.constant 2 : index
    %c0_11 = arith.constant 0 : index
    %24 = vector.load %arg2[%c2, %c0_11] : memref<3x512xf32, #tpu.memory_space<vmem>>, vector<1x512xf32>
    %c0_12 = arith.constant 0 : index
    %c2_13 = arith.constant 2 : index
    %25 = vector.load %arg3[%c0_12, %c2_13] : memref<32x3xf32, #tpu.memory_space<vmem>>, vector<32x1xf32>
    %26 = vector.broadcast %25 : vector<32x1xf32> to vector<32x512xf32>
    %27 = vector.broadcast %24 : vector<1x512xf32> to vector<32x512xf32>
    %28 = arith.cmpf ole, %26, %27 : vector<32x512xf32>
    %c0_14 = arith.constant 0 : index
    %c2_15 = arith.constant 2 : index
    %29 = vector.load %arg4[%c0_14, %c2_15] : memref<32x3xf32, #tpu.memory_space<vmem>>, vector<32x1xf32>
    %30 = vector.broadcast %24 : vector<1x512xf32> to vector<32x512xf32>
    %31 = vector.broadcast %29 : vector<32x1xf32> to vector<32x512xf32>
    %32 = arith.cmpf olt, %30, %31 : vector<32x512xf32>
    %33 = arith.andi %28, %32 : vector<32x512xi1>
    %34 = arith.andi %23, %33 : vector<32x512xi1>
    %35 = arith.extui %34 : vector<32x512xi1> to vector<32x512xi8>
    %c0_16 = arith.constant 0 : index
    %c0_17 = arith.constant 0 : index
    %36 = vector.load %arg6[%c0_16, %c0_17] : memref<32x512xi8, #tpu.memory_space<vmem>>, vector<32x512xi8>
    tpu.vector_store %arg6[%c0_16, %c0_17], %35 {strides = array<i32>} : memref<32x512xi8, #tpu.memory_space<vmem>>, vector<32x512xi8>,
    %37 = arith.extui %34 : vector<32x512xi1> to vector<32x512xi32>
    %38 = arith.sitofp %37 : vector<32x512xi32> to vector<32x512xf32>
    %39 = arith.truncf %38 : vector<32x512xf32> to vector<32x512xbf16>
    %c0_18 = arith.constant 0 : index
    %c0_19 = arith.constant 0 : index
    %c0_20 = arith.constant 0 : index
    %40 = vector.load %arg7[%c0_18, %c0_19, %c0_20] : memref<1x32x128xf32, #tpu.memory_space<vmem>>, vector<1x32x128xf32>
    %41 = vector.shape_cast %40 : vector<1x32x128xf32> to vector<32x128xf32>
    %c0_21 = arith.constant 0 : index
    %c0_22 = arith.constant 0 : index
    %42 = vector.load %arg5[%c0_21, %c0_22] : memref<512x128xbf16, #tpu.memory_space<vmem>>, vector<512x128xbf16>
    %cst = arith.constant dense<0.000000e+00> : vector<32x128xf32>
    %43 = tpu.matmul %39, %42, %cst {dimension_numbers = #tpu.dot_dimension_numbers<[1], [0], [0], [1], [0, 0, 1, 1], [], []>} : vector<32x512xbf16>, vector<512x128xbf16>, vector<32x128xf32> -> vector<32x128xf32>
    %44 = arith.addf %41, %43 : vector<32x128xf32>
    %c0_23 = arith.constant 0 : index
    %c0_24 = arith.constant 0 : index
    %c0_25 = arith.constant 0 : index
    %45 = vector.load %arg7[%c0_23, %c0_24, %c0_25] : memref<1x32x128xf32, #tpu.memory_space<vmem>>, vector<1x32x128xf32>
    %46 = vector.shape_cast %45 : vector<1x32x128xf32> to vector<32x128xf32>
    %47 = vector.shape_cast %44 : vector<32x128xf32> to vector<1x32x128xf32>
    tpu.vector_store %arg7[%c0_23, %c0_24, %c0_25], %47 {strides = array<i32>} : memref<1x32x128xf32, #tpu.memory_space<vmem>>, vector<1x32x128xf32>,
    return
  }
  func.func @transform_0(%arg0: i32, %arg1: i32) -> (i32, i32) {
    %c1_i32 = arith.constant 1 : i32
    %0 = arith.muli %arg0, %c1_i32 : i32
    %1 = arith.addi %0, %arg1 : i32
    %c0_i32 = arith.constant 0 : i32
    %c0_i32_0 = arith.constant 0 : i32
    return %c0_i32, %1 : i32, i32
  }
  func.func @transform_1(%arg0: i32, %arg1: i32) -> (i32, i32) {
    %c0_i32 = arith.constant 0 : i32
    %c0_i32_0 = arith.constant 0 : i32
    %c0_i32_1 = arith.constant 0 : i32
    return %c0_i32, %c0_i32_0 : i32, i32
  }
  func.func @transform_2(%arg0: i32, %arg1: i32) -> (i32, i32) {
    %c0_i32 = arith.constant 0 : i32
    %c0_i32_0 = arith.constant 0 : i32
    %c0_i32_1 = arith.constant 0 : i32
    return %c0_i32, %c0_i32_0 : i32, i32
  }
  func.func @transform_3(%arg0: i32, %arg1: i32) -> (i32, i32) {
    %c1_i32 = arith.constant 1 : i32
    %0 = arith.muli %arg0, %c1_i32 : i32
    %1 = arith.addi %0, %arg1 : i32
    %c0_i32 = arith.constant 0 : i32
    %c0_i32_0 = arith.constant 0 : i32
    return %1, %c0_i32 : i32, i32
  }
  func.func @transform_4(%arg0: i32, %arg1: i32) -> (i32, i32) {
    %c1_i32 = arith.constant 1 : i32
    %0 = arith.muli %arg0, %c1_i32 : i32
    %1 = arith.addi %0, %arg1 : i32
    %c0_i32 = arith.constant 0 : i32
    %c0_i32_0 = arith.constant 0 : i32
    return %c0_i32, %1 : i32, i32
  }
  func.func @transform_5(%arg0: i32, %arg1: i32) -> (i32, i32, i32) {
    %c0_i32 = arith.constant 0 : i32
    %c0_i32_0 = arith.constant 0 : i32
    %c0_i32_1 = arith.constant 0 : i32
    return %arg0, %c0_i32, %c0_i32_0 : i32, i32, i32
  }
}

</mosaic_0001>

<bundles_post_ra>
// kernel: _roi_cut_pallas_padded.1
= control target key start
LH: loop header
LB: loop body
LE: loop exit
PB: predicated region body
PF: predicated region fallthrough
CT: control target
= control target key end

     0   :  { %11 = vsyncpa [#allocation3], 0  ;;  %s2553_s0 = inlined_call_operand.vmem [shape: f32[3,1024], index: 0, kind: input, shape index: {}]   ;;  %s2554_s1 = inlined_call_operand.vmem [shape: f32[32,3], index: 1, kind: input, shape index: {}]   ;;  %s2555_s2 = inlined_call_operand.vmem [shape: f32[32,3], index: 2, kind: input, shape index: {}]   ;;  %s2556_s3 = inlined_call_operand.hbm [shape: bf16[1024,128], index: 3, kind: input, shape index: {}]   ;;  %s2557_s4 = inlined_call_operand.hbm [shape: s8[32,1024], index: 4, kind: output, shape index: {0}]   ;;  %s2558_s5 = inlined_call_operand.hbm [shape: f32[2,32,128], index: 5, kind: output, shape index: {1}]  }
   0x1   :  { %13 = vsyncpa [#allocation3 + $0x1], 0 }
   0x2   :  { %14 = vsyncpa [#allocation4], 0 }
   0x3   :  { %16 = vsyncpa [#allocation4 + $0x1], 0 }
   0x4   :  { %17 = vsyncpa [#allocation7], 0 }
   0x5   :  { %19 = vsyncpa [#allocation7 + $0x1], 0  ;;  %s1708_s18 = smov 0   ;;  %s1710_s19 = smov 0  }
   0x6   :  { %s1712_s20 = smov 0   ;;  %s1714_s21 = smov 0  }
   0x7   :  { %s1716_s22 = smov 0   ;;  %s1718_s23 = smov 0  }
   0x8 LB: > { %s1258_s24 = sadd.s32 4294967295, %s1665_s23   ;;  %s1259_s25 = sadd.s32 4294967294, %s1665_s23   ;;  %s1665_s23 = sphi %s1718_s23, %s25_s23   ;;  %s1661_s22 = sphi %s1716_s22, %s2675_s22   ;;  %s1657_s21 = sphi %s1714_s21, %s2674_s21   ;;  %s1653_s20 = sphi %s1712_s20, %s2673_s20   ;;  %s1649_s19 = sphi %s1710_s19, %s2672_s19   ;;  %s1645_s18 = sphi %s1708_s18, %s2671_s18  }
   0x9   : > { %s37_s26 = sadd.s32 1, %s1661_s22  ;;  %s116_s27 = sadd.s32 1, %s1653_s20 }
   0xa   : > { %p39_p0 = scmp.ge.s32.totalorder %s37_s26, 2  ;;  %p123_p1 = scmp.ne.s32.totalorder %s1653_s20, %s1649_s19 }
   0xb   : > { %p124_p2 = scmp.eq.s32.totalorder %s1665_s23, 0  ;;  %p129_p3 = scmp.ne.s32.totalorder %s1649_s19, %s1645_s18 }
   0xc   : > { %s2677_s26 = smov (%p39_p0, %s37_s26), 0  ;;  %p130_p5 = scmp.eq.s32.totalorder %s1258_s24, 0 }
   0xd   : > { %p1749_p4 = por %p124_p2, %p123_p1  ;;  %s113_s29 = ssub.s32 %s1661_s22, %s2677_s26 }
   0xe   : > { %p155_p6 = scmp.eq.s32.totalorder %s1258_s24, 1  ;;  %p114_p7 = scmp.eq.s32.totalorder %s113_s29, 0 }
   0xf   : > { %p1755_p8 = por %p130_p5, %p129_p3  ;;  %p161_p10 = scmp.eq.s32.totalorder %s1259_s25, 1 }
  0x10   : > { %p1759_p9 = por %p155_p6, %p123_p1  ;;  %p1421_p13 = scmp.lt.s32.totalorder %s1665_s23, 2 }
  0x11   : > { %s1764_s7 = scalar_select %p114_p7, %s1653_s20, %s116_s27  }
  0x12   : > { %s2578_s6 = scalar_select %p1759_p9, 1, 0 }
  0x13   : > { %p1766_p11 = por %p161_p10, %p129_p3  ;;  %s224_s9 = sand.u32 1, %s1653_s20  }
  0x14   : > { %s1262_s10 = sshll.u32 %s224_s9, 8  ;;  %s1345_s11 = sshll.u32 %s1661_s22, 12 }
  0x15   : > { %s2579_s8 = scalar_select %p1766_p11, 1, 0 }
  0x16   : > { %s1777_s14 = scalar_lea.hbm %s2556_s3, %s1345_s11  ;;  %s228_s15 = scalar_lea.vmem [#allocation2], %s1262_s10 }
  0x17   : > { %s236_s16 = sshll.u32 %s228_s15, 4  ;;  %p1783_p0 = pnand %p1421_p13, %p1749_p4  ;;  %s1779_s16 = int_to_ptr.vmem [resolvable:$true] %s236_s16 }
  0x18   : > { %s1788_s24 = scalar_lea.sflag [#allocation3], %s224_s9  ;;  %s1521_s25 = scalar_lea.hbm %s1777_s14, 4096 }
  0x19   : > { %p1522_p2 = scmp.ne.s32.totalorder %s1777_s14, %s1521_s25  ;;  %p1523_p3 = pneg %p1783_p0 }
  0x1a   : > { %s1526_s28 = scalar_lea.hbm %s2556_s3, 8192  ;;  %p1527_p4 = scmp.lt.u32.totalorder %s1777_s14, %s2556_s3 }
  0x1b   : > { %p1524_p5 = pnand %p1523_p3, %p1522_p2  ;;  %p1528_p7 = scmp.lt.u32.totalorder %s1526_s28, %s1521_s25 }
  0x1c   : > { %p1530_p13 = scmp.lt.u32.totalorder %s1521_s25, %s1777_s14 }
  0x1d   : > { %p1525_p6 = pneg %p1524_p5  ;;  %p1529_p10 = por %p1528_p7, %p1527_p4 }
  0x1f   : > { %p1531_p12 = por %p1530_p13, %p1529_p10 }
  0x21   : > { %p1532_p1 = pnand %p1531_p12, %p1525_p6 }
  0x23   : > { %1535 = shalt.err (!%p1532_p1)
}
  0x24   : > { %s1536_s9 = scalar_lea.vmem %s1779_s16, 4096  ;;  %s1667_s12 = smov [#allocation2]  }
  0x25   : > { %p1537_p2 = scmp.ne.s32.totalorder %s1779_s16, %s1536_s9  ;;  %s1541_s13 = sshll.u32 %s1667_s12, 4  ;;  %s1542_s13 = int_to_ptr.vmem [resolvable:$false] %s1541_s13 }
  0x26   : > { %s1543_s15 = scalar_lea.vmem %s1542_s13, 8192  ;;  %p1544_p9 = scmp.lt.s32.totalorder %s1779_s16, %s1542_s13 }
  0x27   : > { %p1539_p5 = pnand %p1537_p2, %p1523_p3  ;;  %p1545_p4 = scmp.lt.s32.totalorder %s1543_s15, %s1536_s9 }
  0x29   : > { %p1540_p11 = pneg %p1539_p5  ;;  %p1546_p7 = por %p1545_p4, %p1544_p9 }
  0x2b   : > { %p1547_p10 = pnand %p1546_p7, %p1540_p11 }
  0x2d   : > { %1550 = shalt.err (!%p1547_p10)
}
  0x2e   : > { %s1668_s25 = smov 64   ;;  %s1669_s27 = smov 4  }
  0x2f   : > { %1413 = dma.hbm_to_vmem [thread:$0]  (!%p1783_p0), %s1777_s14, 4096, %s1779_s16, %s1788_s24, %s1668_s25, %s1668_s25, %s1669_s27  }
  0x30   : > { %p244_p12 = scmp.lt.s32.totalorder %s1665_s23, 3  ;;  %p2581_p1 = scmp.ge.s32.totalorder %s1665_s23, 1 }
  0x32   : > { %p245_p3 = pnand %p2581_p1, %p244_p12 }
  0x33   : > { %s1820_s29 = sand.u32 (!%p245_p3), 1, %s1649_s19  }
  0x34   : > { %248 = sbr.rel (%p245_p3) target bundleno = 533 (0x215), region = 36  ;;  %s1266_s28 = sshll.u32 (!%p245_p3), %s1820_s29, 8 }
  0x35   : > { %s251_s10 = scalar_lea.sflag (!%p245_p3), [#allocation3], %s1820_s29  ;;  %s1824_s11 = scalar_lea.vmem (!%p245_p3), [#allocation2], %s1266_s28 }
  0x3b   : > { %1632 = dma.done.wait (%p1755_p8), %s251_s10, 4096  }
  0x3c   : > { %1634 = vsyncadd (%p1755_p8), %s251_s10, 4294963200  ;;  %v1670_v0 = vmov 0   ;;  %v377_v1 = vld [vmem:[%s2555_s2] sm:$0xff]  ;;  %v1841_v3 = vld [vmem:[%s2555_s2 + $0x8] sm:$0xff]  ;;  %v1671_v13 = vmov 1   ;;  %v1672_v22 = vmov 2   ;;  %v341_v43 = vlaneseq }
  0x3d   : > { %1481 = vset.pattern.permute.xlu1 %v1670_v0  ;;  %1480 = vset.pattern.permute.xlu0 %v1670_v0  ;;  %v316_v2 = vld [vmem:[%s2554_s1] sm:$0xff]  ;;  %v1846_v4 = vld [vmem:[%s2554_s1 + $0x8] sm:$0xff]  ;;  %v1852_v6 = vld [vmem:[%s2554_s1 + $0x10] sm:$0xff]  ;;  %s1269_s24 = sshll.u32 %s1657_s21, 2  ;;  %s1267_s13 = sshll.u32 %s1820_s29, 5 }
  0x3e   : > { %383 = vperm.xlu1 %1481, %v377_v1   ;;  %322 = vperm.xlu0 %1480, %v316_v2   ;;  %v1489_v5 = vld [vmem:[%s1824_s11 + $0x40] sm:$0xff]   ;;  %v1493_v10 = vld [vmem:[%s1824_s11 + $0x48] sm:$0xff]   ;;  %v1863_v11 = vld [vmem:[%s2555_s2 + $0x18] sm:$0xff]  ;;  %p294_p8 = scmp.lt.s32.totalorder %s1269_s24, 7  ;;  %v342_v46 = vshrl.u32 %v341_v43, 7  ;;  %v2634_v43 = vmov 0 }
  0x3f   : > { %v1490_v7 = vld [vmem:[%s1824_s11 + $0xc0] sm:$0xff]   ;;  %1348 = vmatprep.subr.bf16.mxu0 %v1489_v5  ;;  %v1494_v12 = vld [vmem:[%s1824_s11 + $0xc8] sm:$0xff]   ;;  %v1497_v16 = vld [vmem:[%s1824_s11 + $0x50] sm:$0xff]   ;;  %s2353_s15 = scalar_lea.vmem [#allocation5], %s1267_s13  ;;  %s1346_s25 = sshll.u32 %s1657_s21, 9 }
  0x40   : > { %v1491_v8 = vld [vmem:[%s1824_s11] sm:$0xff]   ;;  %1376 = vmatprep.subr.bf16.mxu1 %v1490_v7  ;;  %v1495_v14 = vld [vmem:[%s1824_s11 + $0x8] sm:$0xff]   ;;  %v1498_v17 = vld [vmem:[%s1824_s11 + $0xd0] sm:$0xff]   ;;  %s2679_s24 = smov (!%p294_p8, %s1269_s24), 7  ;;  %v347_v49 = vsub.s32 1, %v342_v46  ;;  %v355_v51 = vsub.s32 3, %v342_v46  ;;  %s2474_s10 = scalar_lea.hbm %s2557_s4, %s1346_s25 }
  0x41   : > { %v1492_v9 = vld [vmem:[%s1824_s11 + $0x80] sm:$0xff]   ;;  %1349 = vmatpush3.bf16.msra.mxu0 %v1491_v8  ;;  %v1496_v15 = vld [vmem:[%s1824_s11 + $0x88] sm:$0xff]   ;;  %v1499_v18 = vld [vmem:[%s1824_s11 + $0x10] sm:$0xff]   ;;  %s1118_s14 = sshll.u32 %s2353_s15, 4  ;;  %s1098_s16 = scalar_lea.sflag [#allocation4], %s1820_s29  ;;  %s1119_s14 = int_to_ptr.vmem [resolvable:$true] %s1118_s14 }
  0x42   : > { %388 = vperm.xlu1 %1481, %v1841_v3   ;;  %327 = vperm.xlu0 %1480, %v1846_v4   ;;  %v1500_v19 = vld [vmem:[%s1824_s11 + $0x90] sm:$0xff]   ;;  %v1501_v20 = vld [vmem:[%s1824_s11 + $0x58] sm:$0xff]   ;;  %v1505_v25 = vld [vmem:[%s1824_s11 + $0x60] sm:$0xff]   ;;  %s1551_s17 = scalar_lea.vmem %s1119_s14, 512  ;;  %p2668_p11 = scmp.ne.s32.totalorder %s2578_s6, 0 }
  0x43   : > { %1377 = vmatpush3.bf16.msra.mxu1 %v1492_v9  ;;  %1350 = vmatprep.subr.bf16.mxu0 %v1493_v10  ;;  %v1502_v21 = vld [vmem:[%s1824_s11 + $0xd8] sm:$0xff]   ;;  %v1506_v27 = vld [vmem:[%s1824_s11 + $0xe0] sm:$0xff]   ;;  %v1509_v30 = vld [vmem:[%s1824_s11 + $0x68] sm:$0xff]   ;;  %p1552_p9 = scmp.ne.s32.totalorder %s1119_s14, %s1551_s17 }
  0x44   : > { %1378 = vmatprep.subr.bf16.mxu1 %v1494_v12  ;;  %v1503_v23 = vld [vmem:[%s1824_s11 + $0x18] sm:$0xff]   ;;  %v1507_v28 = vld [vmem:[%s1824_s11 + $0x20] sm:$0xff]   ;;  %v1510_v31 = vld [vmem:[%s1824_s11 + $0xe8] sm:$0xff]   ;;  %v2594_v12 = vmov 0 }
  0x45   : > { %1351 = vmatpush3.bf16.msra.mxu0 %v1495_v14  ;;  %v1504_v24 = vld [vmem:[%s1824_s11 + $0x98] sm:$0xff]   ;;  %v1508_v29 = vld [vmem:[%s1824_s11 + $0xa0] sm:$0xff]   ;;  %v1511_v32 = vld [vmem:[%s1824_s11 + $0x28] sm:$0xff]   ;;  %p1553_p0 = pnand %p1552_p9, %p2668_p11 }
  0x46   : > { %1482 = vset.pattern.permute.xlu1 %v1671_v13  ;;  %332 = vperm.xlu0 %1480, %v1852_v6   ;;  %v319_v26 = vld [vmem:[%s2554_s1 + $0x18] sm:$0xff]  ;;  %v1512_v33 = vld [vmem:[%s1824_s11 + $0xa8] sm:$0xff]   ;;  %v1513_v34 = vld [vmem:[%s1824_s11 + $0x70] sm:$0xff]  }
  0x47   : > { %440 = vperm.xlu1 %1482, %v1846_v4   ;;  %1379 = vmatpush3.bf16.msra.mxu1 %v1496_v15  ;;  %v1514_v35 = vld [vmem:[%s1824_s11 + $0xf0] sm:$0xff]   ;;  %v1517_v39 = vld [vmem:[%s1824_s11 + $0x78] sm:$0xff]   ;;  %p1554_p6 = pneg %p1553_p0 }
  0x48   : > { %1352 = vmatprep.subr.bf16.mxu0 %v1497_v16  ;;  %1380 = vmatprep.subr.bf16.mxu1 %v1498_v17  ;;  %v1515_v36 = vld [vmem:[%s1824_s11 + $0x30] sm:$0xff]   ;;  %v1518_v40 = vld [vmem:[%s1824_s11 + $0xf8] sm:$0xff]   ;;  %v2596_v17 = vmov 0 }
  0x49   : > { %1353 = vmatpush3.bf16.msra.mxu0 %v1499_v18  ;;  %v379_v37 = vld [vmem:[%s2555_s2 + $0x10] sm:$0xff]  ;;  %v1519_v41 = vld [vmem:[%s1824_s11 + $0x38] sm:$0xff]   ;;  %v351_v18 = vsub.s32 2, %v342_v46 }
  0x4a   : > { %398 = vperm.xlu0 %1480, %v1863_v11   ;;  %1354 = vmatprep.subr.bf16.mxu0 %v1501_v20  ;;  %v1516_v38 = vld [vmem:[%s1824_s11 + $0xb0] sm:$0xff]   ;;  %v1520_v42 = vld [vmem:[%s1824_s11 + $0xb8] sm:$0xff]   ;;  %s1270_s11 = sshll.u32 %s2679_s24, 2  ;;  %s1674_s24 = smov [#allocation5]  }
  0x4b   : > { %489 = vperm.xlu1 %1482, %v377_v1   ;;  %1381 = vmatpush3.bf16.msra.mxu1 %v1500_v19  ;;  %s297_s12 = scalar_lea.vmem %s2553_s0, %s1270_s11  ;;  %v2598_v19 = vmov 0  ;;  %s1555_s11 = sshll.u32 %s1674_s24, 4  ;;  %s1556_s11 = int_to_ptr.vmem [resolvable:$false] %s1555_s11 }
  0x4c   : > { %1382 = vmatprep.subr.bf16.mxu1 %v1502_v21  ;;  %v1924_v50 = vld [vmem:[%s297_s12] ss:$4 sm:$0xf]  ;;  %v1938_v57 = vld [vmem:[%s297_s12 + $0x1] ss:$4 sm:$0xf]  ;;  %p1558_p13 = scmp.lt.s32.totalorder %s1119_s14, %s1556_s11 }
  0x4d   : > { %1355 = vmatpush3.bf16.msra.mxu0 %v1503_v23  ;;  %v1931_v54 = vrot.slane %v1924_v50, %v347_v49  ;;  %v1934_v55 = vrot.slane %v1924_v50, %v355_v51  ;;  %v1955_v59 = vrot.slane %v1938_v57, %v347_v49  ;;  %v1958_v60 = vrot.slane %v1938_v57, %v355_v51  ;;  %v1970_v63 = vld [vmem:[%s297_s12 + $0x2] ss:$4 sm:$0xf]  ;;  %s1557_s30 = scalar_lea.vmem %s1556_s11, 1024 }
  0x4e   : > { %1485 = vset.pattern.permute.xlu0 %v1671_v13  ;;  %1356 = vmatprep.subr.bf16.mxu0 %v1505_v25  ;;  %v2001_v7 = vrot.slane %v1970_v63, %v347_v49  ;;  %v2601_v21 = vmov 0  ;;  %p1559_p2 = scmp.lt.s32.totalorder %s1557_s30, %s1551_s17 }
  0x4f   : > { %1483 = vset.pattern.permute.xlu1 %v1672_v22  ;;  %436 = vperm.xlu0 %1485, %v316_v2  }
  0x50   : > { %555 = vperm.xlu1 %1483, %v316_v2   ;;  %1383 = vmatpush3.bf16.msra.mxu1 %v1504_v24  ;;  %v2605_v24 = vmov 0  ;;  %p1560_p5 = por %p1559_p2, %p1558_p13 }
  0x51   : > { %1384 = vmatprep.subr.bf16.mxu1 %v1506_v27  ;;  %1357 = vmatpush3.bf16.msra.mxu0 %v1507_v28  ;;  %v2612_v27 = vmov 0 }
  0x52   : > { %1358 = vmatprep.subr.bf16.mxu0 %v1509_v30  ;;  %p1561_p4 = pnand %p1560_p5, %p1554_p6 }
  0x53   : > { %493 = vperm.xlu0 %1485, %v1841_v3  }
  0x54   : > { %608 = vperm.xlu1 %1483, %v377_v1   ;;  %1385 = vmatpush3.bf16.msra.mxu1 %v1508_v29  ;;  %v1673_v29 = vmov 1.0|1.0  }
  0x55   : > { %1386 = vmatprep.subr.bf16.mxu1 %v1510_v31  ;;  %1359 = vmatpush3.bf16.msra.mxu0 %v1511_v32  ;;  %v2617_v31 = vmov 0 }
  0x56   : > { %1360 = vmatprep.subr.bf16.mxu0 %v1513_v34 }
  0x57   : > { %448 = vperm.xlu0 %1485, %v319_v26  }
  0x58   : > { %612 = vperm.xlu1 %1483, %v1841_v3   ;;  %1387 = vmatpush3.bf16.msra.mxu1 %v1512_v33  ;;  %v2586_v3 = vmov 0 }
  0x59   : > { %1388 = vmatprep.subr.bf16.mxu1 %v1514_v35  ;;  %1361 = vmatpush3.bf16.msra.mxu0 %v1515_v36  ;;  %v2201_v36 = vrot.slane %v1938_v57, %v351_v18 }
  0x5a   : > { %1362 = vmatprep.subr.bf16.mxu0 %v1517_v39 }
  0x5b   : > { %1487 = vset.pattern.permute.xlu0 %v1672_v22 }
  0x5c   : > { %1484 = vset.pattern.permute.xlu1 %v1670_v0  ;;  %559 = vperm.xlu0 %1487, %v1846_v4   ;;  %v343_v4 = vsub.s32 0, %v342_v46 }
  0x5d   : > { %337 = vperm.xlu1 %1484, %v319_v26   ;;  %1389 = vmatpush3.bf16.msra.mxu1 %v1516_v38  ;;  %v2630_v38 = vmov 0 }
  0x5e   : > { %1390 = vmatprep.subr.bf16.mxu1 %v1518_v40  ;;  %1363 = vmatpush3.bf16.msra.mxu0 %v1519_v41  ;;  %v2044_v15 = vrot.slane %v1938_v57, %v343_v4  ;;  %v2143_v30 = vrot.slane %v1970_v63, %v343_v4  ;;  %v2222_v40 = vrot.slane %v1970_v63, %v351_v18 }
  0x60   : > { %563 = vperm.xlu0 %1487, %v1852_v6  }
  0x61   : > { %393 = vperm.xlu1 %1484, %v379_v37   ;;  %1391 = vmatpush3.bf16.msra.mxu1 %v1520_v42  ;;  %v2632_v42 = vmov 0 }
  0x64   : > { %620 = vperm.xlu0 %1487, %v1863_v11  }
  0x65   : > { %1486 = vset.pattern.permute.xlu1 %v1671_v13  ;;  %v2039_v13 = vrot.slane %v1970_v63, %v355_v51 }
  0x66   : > { %444 = vperm.xlu1 %1486, %v1852_v6  }
  0x6a   : > { %497 = vperm.xlu1 %1486, %v379_v37  }
  0x6e   : > { %501 = vperm.xlu1 %1486, %v1863_v11   ;;  %v2022_v11 = vrot.slane %v1924_v50, %v343_v4 }
  0x72   : > { %1488 = vset.pattern.permute.xlu1 %v1672_v22  ;;  %v2603_v22 = vmov 0 }
  0x73   : > { %567 = vperm.xlu1 %1488, %v319_v26   ;;  %v2110_v26 = vrot.slane %v1924_v50, %v351_v18 }
  0x77   : > { %616 = vperm.xlu1 %1488, %v379_v37   ;;  %v2628_v37 = vmov 0 }
  0xbd   : > { %v1913_v44 = vpop.permute.xlu1 %383  ;;  %v1915_v45 = vpop.permute.xlu0 %322 }
  0xbe   : > { %vm362_vm0 = vcmp.le.f32.partialorder %v1915_v45, %v1931_v54  ;;  %vm402_vm1 = vcmp.lt.f32.partialorder %v1931_v54, %v1913_v44  ;;  %vm364_vm2 = vcmp.le.f32.partialorder %v1915_v45, %v1934_v55  ;;  %vm404_vm3 = vcmp.lt.f32.partialorder %v1934_v55, %v1913_v44 }
  0xbf   : > { %vm1960_vm6 = vmand %vm362_vm0, %vm402_vm1 }
  0xc0   : > { %vm1972_vm9 = vmand %vm364_vm2, %vm404_vm3 }
  0xc1   : > { %v1920_v47 = vpop.permute.xlu1 %388  ;;  %v1922_v48 = vpop.permute.xlu0 %327 }
  0xc2   : > { %vm366_vm4 = vcmp.le.f32.partialorder %v1922_v48, %v1931_v54  ;;  %vm406_vm5 = vcmp.lt.f32.partialorder %v1931_v54, %v1920_v47  ;;  %vm368_vm7 = vcmp.le.f32.partialorder %v1922_v48, %v1934_v55  ;;  %vm408_vm8 = vcmp.lt.f32.partialorder %v1934_v55, %v1920_v47 }
  0xc3   : > { %vm1978_vm10 = vmand %vm366_vm4, %vm406_vm5 }
  0xc4   : > { %v2587_v3 = vsel %vm1978_vm10, 4294967295, %v2586_v3  ;;  %vm1992_vm15 = vmand %vm368_vm7, %vm408_vm8 }
  0xc5   : > { %v1926_v52 = vpop.permute.xlu0 %332 }
  0xc6   : > { %v1928_v53 = vpop.permute.xlu1 %440 }
  0xc7   : > { %vm477_vm3 = vcmp.le.f32.partialorder %v1928_v53, %v1955_v59 }
  0xc9   : > { %v1936_v56 = vpop.permute.xlu0 %398 }
  0xca   : > { %v1940_v58 = vpop.permute.xlu1 %489 }
  0xcb   : > { %vm505_vm12 = vcmp.lt.f32.partialorder %v1955_v59, %v1940_v58  ;;  %vm507_vm1 = vcmp.lt.f32.partialorder %v1958_v60, %v1940_v58 }
  0xce   : > { %v1968_v62 = vpop.permute.xlu0 %436 }
  0xcf   : > { %v1976_v2 = vpop.permute.xlu1 %555  ;;  %vm473_vm11 = vcmp.le.f32.partialorder %v1968_v62, %v1955_v59  ;;  %vm475_vm13 = vcmp.le.f32.partialorder %v1968_v62, %v1958_v60 }
  0xd0   : > { %vm1988_vm14 = vmand %vm473_vm11, %vm505_vm12  ;;  %vm592_vm12 = vcmp.le.f32.partialorder %v1976_v2, %v2001_v7  ;;  %vm361_vm11 = vcmp.le.f32.partialorder %v1915_v45, %v2022_v11 }
  0xd1   : > { %vm537_vm0 = vmand %vm1960_vm6, %vm1988_vm14  ;;  %vm405_vm6 = vcmp.lt.f32.partialorder %v2022_v11, %v1920_v47  ;;  %vm365_vm14 = vcmp.le.f32.partialorder %v1922_v48, %v2022_v11 }
  0xd2   : > { %v2005_v8 = vpop.permute.xlu0 %493  ;;  %vm2007_vm2 = vmand %vm475_vm13, %vm507_vm1 }
  0xd3   : > { %v2011_v10 = vpop.permute.xlu1 %608  ;;  %vm509_vm4 = vcmp.lt.f32.partialorder %v1955_v59, %v2005_v8  ;;  %vm511_vm13 = vcmp.lt.f32.partialorder %v1958_v60, %v2005_v8 }
  0xd4   : > { %vm2024_vm7 = vmand %vm477_vm3, %vm509_vm4  ;;  %vm624_vm8 = vcmp.lt.f32.partialorder %v2001_v7, %v2011_v10  ;;  %vm479_vm4 = vcmp.le.f32.partialorder %v1928_v53, %v1958_v60 }
  0xd5   : > { %v2595_v12 = vsel %vm2024_vm7, 4294967295, %v2594_v12  ;;  %vm640_vm1 = vmand %vm592_vm12, %vm624_vm8  ;;  %vm626_vm8 = vcmp.lt.f32.partialorder %v2039_v13, %v2011_v10  ;;  %vm401_vm12 = vcmp.lt.f32.partialorder %v2022_v11, %v1913_v44 }
  0xd6   : > { %v2041_v14 = vpop.permute.xlu0 %448  ;;  %vm2053_vm3 = vmand %vm537_vm0, %vm640_vm1  ;;  %vm472_vm0 = vcmp.le.f32.partialorder %v1968_v62, %v2044_v15 }
  0xd7   : > { %v2046_v16 = vpop.permute.xlu1 %612  ;;  %v2597_v17 = vsel %vm2053_vm3, 4294967295, %v2596_v17  ;;  %vm2065_vm5 = vmand %vm479_vm4, %vm511_vm13  ;;  %vm594_vm13 = vcmp.le.f32.partialorder %v1976_v2, %v2039_v13  ;;  %vm504_vm3 = vcmp.lt.f32.partialorder %v2044_v15, %v1940_v58 }
  0xd8   : > { %v2599_v19 = vsel %vm2065_vm5, 4294967295, %v2598_v19  ;;  %vm642_vm4 = vmand %vm594_vm13, %vm626_vm8  ;;  %vm628_vm13 = vcmp.lt.f32.partialorder %v2001_v7, %v2046_v16 }
  0xd9   : > { %vm2600_vm7 = vmand %vm1972_vm9, %vm2007_vm2 }
  0xda   : > { %vm2088_vm10 = vmand %vm2600_vm7, %vm642_vm4 }
  0xdb   : > { %v560_v20 = vpop.permute.xlu0 %559  ;;  %v2602_v21 = vsel %vm2088_vm10, 4294967295, %v2601_v21  ;;  %vm2092_vm1 = vmand %vm361_vm11, %vm401_vm12  ;;  %vm2609_vm11 = vnez %v2587_v3  ;;  %vm2610_vm12 = vnez %v2595_v12 }
  0xdc   : > { %v2604_v22 = vsel %vm2092_vm1, 4294967295, %v2603_v22  ;;  %v2096_v23 = vpop.permute.xlu1 %337  ;;  %vm596_vm8 = vcmp.le.f32.partialorder %v560_v20, %v2001_v7  ;;  %vm2101_vm5 = vmand %vm365_vm14, %vm405_vm6  ;;  %vm598_vm7 = vcmp.le.f32.partialorder %v560_v20, %v2039_v13  ;;  %vm630_vm14 = vcmp.lt.f32.partialorder %v2039_v13, %v2046_v16 }
  0xdd   : > { %v2606_v24 = vsel %vm2101_vm5, 4294967295, %v2605_v24  ;;  %vm2105_vm9 = vmand %vm472_vm0, %vm504_vm3  ;;  %vm2614_vm3 = vnez %v2597_v17 }
  0xde   : > { %vm644_vm2 = vmand %vm596_vm8, %vm628_vm13  ;;  %vm403_vm13 = vcmp.lt.f32.partialorder %v2110_v26, %v1913_v44 }
  0xdf   : > { %vm2611_vm4 = vmand %vm2609_vm11, %vm2610_vm12  ;;  %vm2615_vm11 = vnez %v2599_v19 }
  0xe0   : > { %vm2118_vm1 = vmand %vm2611_vm4, %vm644_vm2  ;;  %v2130_v28 = vpop.permute.xlu1 %393  ;;  %vm363_vm2 = vcmp.le.f32.partialorder %v1915_v45, %v2110_v26  ;;  %v2271_v45 = vpop.permute.xlu0 %563 }
  0xe1   : > { %v2613_v27 = vsel %vm2118_vm1, 4294967295, %v2612_v27  ;;  %vm2564_vm6 = vmpackc.low %vm2118_vm1, %vm2614_vm3  ;;  %vm2622_vm3 = vnez %v2604_v22 }
  0xe2   : > { %1322 = vmatprep.mubr.msk.bf16.mxu0 %vm2564_vm6, %v1673_v29  ;;  %vm646_vm8 = vmand %vm598_vm7, %vm630_vm14  ;;  %vm407_vm7 = vcmp.lt.f32.partialorder %v2110_v26, %v1920_v47  ;;  %vm367_vm14 = vcmp.le.f32.partialorder %v1922_v48, %v2110_v26  ;;  %vm476_vm6 = vcmp.le.f32.partialorder %v1928_v53, %v2044_v15 }
  0xe3   : > { %vm2616_vm12 = vmand %vm1992_vm15, %vm2615_vm11  ;;  %vm623_vm15 = vcmp.lt.f32.partialorder %v2143_v30, %v2011_v10 }
  0xe4   : > { %vm2150_vm4 = vmand %vm2616_vm12, %vm646_vm8  ;;  %vm2619_vm8 = vcmp.lt.f32.partialorder %v2044_v15, %v2005_v8  ;;  %vm595_vm12 = vcmp.le.f32.partialorder %v560_v20, %v2143_v30  ;;  %v2303_v50 = vpop.permute.xlu0 %620 }
  0xe5   : > { %v2618_v31 = vsel %vm2150_vm4, 4294967295, %v2617_v31  ;;  %vm2567_vm0 = vmpackc.low %vm2150_vm4, %vm2088_vm10  ;;  %v2198_v35 = vpop.permute.xlu1 %444 }
  0xe6   : > { %1330 = vmatprep.mubr.msk.bf16.mxu1 %vm2567_vm0, %v1673_v29  ;;  %vm2175_vm11 = vmand %vm476_vm6, %vm2619_vm8  ;;  %vm591_vm0 = vcmp.le.f32.partialorder %v1976_v2, %v2143_v30  ;;  %vm2625_vm6 = vnez %v2606_v24 }
  0xe7   : > { %vm536_vm1 = vmand %vm2622_vm3, %vm2105_vm9  ;;  %vm627_vm9 = vcmp.lt.f32.partialorder %v2143_v30, %v2046_v16 }
  0xe8   : > { %vm2184_vm5 = vmand %vm363_vm2, %vm403_vm13  ;;  %vm474_vm2 = vcmp.le.f32.partialorder %v1968_v62, %v2201_v36 }
  0xe9   : > { %vm540_vm8 = vmand %vm2625_vm6, %vm2175_vm11  ;;  %v2217_v39 = vpop.permute.xlu1 %497 }
  0xea   : > { %vm2194_vm10 = vmand %vm367_vm14, %vm407_vm7  ;;  %vm510_vm7 = vcmp.lt.f32.partialorder %v2201_v36, %v2005_v8 }
  0xeb   : > { %vm639_vm3 = vmand %vm591_vm0, %vm623_vm15  ;;  %vm506_vm0 = vcmp.lt.f32.partialorder %v2201_v36, %v1940_v58  ;;  %vm478_vm15 = vcmp.le.f32.partialorder %v1928_v53, %v2201_v36 }
  0xec   : > { %vm643_vm13 = vmand %vm595_vm12, %vm627_vm9  ;;  %vm625_vm12 = vcmp.lt.f32.partialorder %v2222_v40, %v2011_v10 }
  0xed   : > { %vm2207_vm4 = vmand %vm536_vm1, %vm639_vm3  ;;  %v2241_v41 = vpop.permute.xlu1 %501  ;;  %vm593_vm3 = vcmp.le.f32.partialorder %v1976_v2, %v2222_v40 }
  0xee   : > { %v2629_v37 = vsel %vm2207_vm4, 4294967295, %v2628_v37  ;;  %vm2213_vm14 = vmand %vm540_vm8, %vm643_vm13  ;;  %vm597_vm8 = vcmp.le.f32.partialorder %v560_v20, %v2222_v40 }
  0xef   : > { %v2631_v38 = vsel %vm2213_vm14, 4294967295, %v2630_v38  ;;  %vm2570_vm1 = vmpackc.low %vm2213_vm14, %vm2207_vm4 }
  0xf0   : > { %1324 = vmatmul.mubr.msk.bf16.vlgmr.msra.gmra.mrb[0].mxu0 %vm2570_vm1, %v1673_v29  ;;  %vm522_vm11 = vmand %vm474_vm2, %vm506_vm0  ;;  %vm629_vm2 = vcmp.lt.f32.partialorder %v2222_v40, %v2046_v16 }
  0xf1   : > { %vm526_vm6 = vmand %vm478_vm15, %vm510_vm7  ;;  %vm370_vm15 = vcmp.le.f32.partialorder %v1926_v52, %v1931_v54 }
  0xf2   : > { %vm538_vm9 = vmand %vm2184_vm5, %vm522_vm11  ;;  %v2257_v44 = vpop.permute.xlu1 %567  ;;  %vm410_vm5 = vcmp.lt.f32.partialorder %v1931_v54, %v2130_v28  ;;  %vm513_vm11 = vcmp.lt.f32.partialorder %v1955_v59, %v2217_v39 }
  0xf3   : > { %vm542_vm13 = vmand %vm2194_vm10, %vm526_vm6  ;;  %vm517_vm6 = vcmp.lt.f32.partialorder %v1955_v59, %v2241_v41 }
  0xf4   : > { %vm641_vm0 = vmand %vm593_vm3, %vm625_vm12  ;;  %vm414_vm12 = vcmp.lt.f32.partialorder %v1931_v54, %v1936_v56 }
  0xf5   : > { %vm645_vm1 = vmand %vm597_vm8, %vm629_vm2  ;;  %vm485_vm2 = vcmp.le.f32.partialorder %v2041_v14, %v1955_v59 }
  0xf6   : > { %vm2249_vm4 = vmand %vm538_vm9, %vm641_vm0  ;;  %v2279_v46 = vpop.permute.xlu1 %616  ;;  %vm481_vm9 = vcmp.le.f32.partialorder %v2198_v35, %v1955_v59 }
  0xf7   : > { %v2633_v42 = vsel %vm2249_vm4, 4294967295, %v2632_v42  ;;  %vm2253_vm7 = vmand %vm542_vm13, %vm645_vm1  ;;  %vm374_vm1 = vcmp.le.f32.partialorder %v2096_v23, %v1931_v54  ;;  %vm632_vm3 = vcmp.lt.f32.partialorder %v2001_v7, %v2279_v46 }
  0xf8   : > { %v2635_v43 = vsel %vm2253_vm7, 4294967295, %v2634_v43  ;;  %vm2572_vm10 = vmpackc.low %vm2253_vm7, %vm2249_vm4  ;;  %vm376_vm7 = vcmp.le.f32.partialorder %v2096_v23, %v1934_v55 }
  0xf9   : > { %1332 = vmatmul.mubr.msk.bf16.vlgmr.msra.gmra.mrb[0].mxu1 %vm2572_vm10, %v1673_v29  ;;  %vm2285_vm8 = vmand %vm370_vm15, %vm410_vm5  ;;  %vm600_vm5 = vcmp.le.f32.partialorder %v2271_v45, %v2001_v7  ;;  %vm604_vm10 = vcmp.le.f32.partialorder %v2257_v44, %v2001_v7 }
  0xfa   : > { %vm2293_vm13 = vmand %vm374_vm1, %vm414_vm12  ;;  %vm634_vm12 = vcmp.lt.f32.partialorder %v2039_v13, %v2279_v46 }
  0xfb   : > { %vm2299_vm0 = vmand %vm481_vm9, %vm513_vm11  ;;  %vm636_vm9 = vcmp.lt.f32.partialorder %v2001_v7, %v2303_v50 }
  0xfc   : > { %vm533_vm15 = vmand %vm485_vm2, %vm517_vm6  ;;  %vm602_vm6 = vcmp.le.f32.partialorder %v2271_v45, %v2039_v13 }
  0xfd   : > { %vm648_vm1 = vmand %vm600_vm5, %vm632_vm3 }
  0xfe   : > { %vm545_vm11 = vmand %vm2285_vm8, %vm2299_vm0  ;;  %vm412_vm8 = vcmp.lt.f32.partialorder %v1934_v55, %v2130_v28 }
  0xff   : > { %vm549_vm4 = vmand %vm2293_vm13, %vm533_vm15  ;;  %vm372_vm13 = vcmp.le.f32.partialorder %v1926_v52, %v1934_v55  ;;  %vm2644_vm15 = vnez %v2613_v27 }
 0x100   : > { %vm652_vm2 = vmand %vm604_vm10, %vm636_vm9  ;;  %vm515_vm10 = vcmp.lt.f32.partialorder %v1958_v60, %v2217_v39 }
 0x101   : > { %vm2322_vm3 = vmand %vm602_vm6, %vm634_vm12  ;;  %vm2645_vm12 = vnez %v2597_v17 }
 0x102   : > { %vm664_vm5 = vmand %vm545_vm11, %vm648_vm1  ;;  %vm519_vm11 = vcmp.lt.f32.partialorder %v1958_v60, %v2241_v41 }
 0x103   : > { %vm668_vm0 = vmand %vm549_vm4, %vm652_vm2  ;;  %vm416_vm4 = vcmp.lt.f32.partialorder %v1934_v55, %v1936_v56  ;;  %vm483_vm2 = vcmp.le.f32.partialorder %v2198_v35, %v1958_v60 }
 0x104   : > { %vm675_vm14 = vmpackc.low %vm668_vm0, %vm664_vm5  ;;  %vm487_vm5 = vcmp.le.f32.partialorder %v2041_v14, %v1958_v60 }
 0x105   : > { %vm2646_vm9 = vmpackc.low %vm2644_vm15, %vm2645_vm12  ;;  %1326 = vmatprep.mubr.msk.bf16.mxu0 %vm675_vm14, %v1673_v29  ;;  %vm631_vm15 = vcmp.lt.f32.partialorder %v2143_v30, %v2279_v46 }
 0x106   : > { %vm676_vm1 = vmpackc.even %vm675_vm14, %vm2646_vm9 }
 0x107   : > { %v684_v53 = vsel %vm676_vm1, 16843009, %v1670_v0  ;;  %vm2345_vm6 = vmand %vm372_vm13, %vm412_vm8  ;;  %vm606_vm8 = vcmp.le.f32.partialorder %v2257_v44, %v2039_v13  ;;  %vm599_vm1 = vcmp.le.f32.partialorder %v2271_v45, %v2143_v30 }
 0x108   : > { %688 = vst [vmem:[%s2353_s15 + $0x8] sm:$0xff] %v684_v53  ;;  %vm2356_vm14 = vmand %vm376_vm7, %vm416_vm4  ;;  %vm638_vm7 = vcmp.lt.f32.partialorder %v2039_v13, %v2303_v50 }
 0x109   : > { %vm531_vm0 = vmand %vm483_vm2, %vm515_vm10 }
 0x10a   : > { %vm535_vm13 = vmand %vm487_vm5, %vm519_vm11  ;;  %vm373_vm5 = vcmp.le.f32.partialorder %v2096_v23, %v2022_v11 }
 0x10b   : > { %vm547_vm12 = vmand %vm2345_vm6, %vm531_vm0  ;;  %vm409_vm6 = vcmp.lt.f32.partialorder %v2022_v11, %v2130_v28  ;;  %vm369_vm0 = vcmp.le.f32.partialorder %v1926_v52, %v2022_v11 }
 0x10c   : > { %vm551_vm9 = vmand %vm2356_vm14, %vm535_vm13  ;;  %vm2653_vm13 = vnez %v2618_v31 }
 0x10d   : > { %vm654_vm10 = vmand %vm606_vm8, %vm638_vm7  ;;  %vm512_vm8 = vcmp.lt.f32.partialorder %v2044_v15, %v2217_v39 }
 0x10e   : > { %vm2374_vm4 = vmand %vm599_vm1, %vm631_vm15  ;;  %vm2654_vm15 = vnez %v2602_v21 }
 0x10f   : > { %vm666_vm11 = vmand %vm547_vm12, %vm2322_vm3  ;;  %vm413_vm12 = vcmp.lt.f32.partialorder %v2022_v11, %v1936_v56 }
 0x110   : > { %vm670_vm2 = vmand %vm551_vm9, %vm654_vm10  ;;  %vm516_vm9 = vcmp.lt.f32.partialorder %v2044_v15, %v2241_v41  ;;  %vm480_vm10 = vcmp.le.f32.partialorder %v2198_v35, %v2044_v15 }
 0x111   : > { %vm681_vm14 = vmpackc.low %vm670_vm2, %vm666_vm11  ;;  %vm484_vm2 = vcmp.le.f32.partialorder %v2041_v14, %v2044_v15 }
 0x112   : > { %vm2655_vm7 = vmpackc.low %vm2653_vm13, %vm2654_vm15  ;;  %1334 = vmatprep.mubr.msk.bf16.mxu1 %vm681_vm14, %v1673_v29  ;;  %vm603_vm13 = vcmp.le.f32.partialorder %v2257_v44, %v2143_v30 }
 0x113   : > { %vm682_vm3 = vmpackc.even %vm681_vm14, %vm2655_vm7 }
 0x114   : > { %v686_v58 = vsel %vm682_vm3, 16843009, %v1670_v0  ;;  %vm2399_vm1 = vmand %vm369_vm0, %vm409_vm6  ;;  %vm633_vm6 = vcmp.lt.f32.partialorder %v2222_v40, %v2279_v46  ;;  %vm601_vm3 = vcmp.le.f32.partialorder %v2271_v45, %v2222_v40 }
 0x115   : > { %690 = vst [vmem:[%s2353_s15 + $0x18] sm:$0xff] %v686_v58  ;;  %vm2406_vm11 = vmand %vm373_vm5, %vm413_vm12  ;;  %vm635_vm5 = vcmp.lt.f32.partialorder %v2143_v30, %v2303_v50 }
 0x116   : > { %vm528_vm14 = vmand %vm480_vm10, %vm512_vm8 }
 0x117   : > { %vm532_vm15 = vmand %vm484_vm2, %vm516_vm9  ;;  %vm375_vm2 = vcmp.le.f32.partialorder %v2096_v23, %v2110_v26 }
 0x118   : > { %vm544_vm0 = vmand %vm2399_vm1, %vm528_vm14  ;;  %vm411_vm1 = vcmp.lt.f32.partialorder %v2110_v26, %v2130_v28  ;;  %vm371_vm14 = vcmp.le.f32.partialorder %v1926_v52, %v2110_v26 }
 0x119   : > { %vm548_vm7 = vmand %vm2406_vm11, %vm532_vm15  ;;  %vm2662_vm15 = vnez %v2631_v38 }
 0x11a   : > { %vm651_vm8 = vmand %vm603_vm13, %vm635_vm5  ;;  %vm514_vm13 = vcmp.lt.f32.partialorder %v2201_v36, %v2217_v39 }
 0x11b   : > { %vm2424_vm12 = vmand %vm601_vm3, %vm633_vm6  ;;  %vm2663_vm6 = vnez %v2629_v37 }
 0x11c   : > { %vm663_vm9 = vmand %vm544_vm0, %vm2374_vm4  ;;  %vm415_vm0 = vcmp.lt.f32.partialorder %v2110_v26, %v1936_v56 }
 0x11d   : > { %vm667_vm10 = vmand %vm548_vm7, %vm651_vm8  ;;  %vm518_vm7 = vcmp.lt.f32.partialorder %v2201_v36, %v2241_v41  ;;  %vm482_vm8 = vcmp.le.f32.partialorder %v2198_v35, %v2201_v36 }
 0x11e   : > { %vm672_vm11 = vmpackc.low %vm667_vm10, %vm663_vm9  ;;  %vm486_vm10 = vcmp.le.f32.partialorder %v2041_v14, %v2201_v36 }
 0x11f   : > { %vm2664_vm5 = vmpackc.low %vm2662_vm15, %vm2663_vm6  ;;  %1328 = vmatmul.mubr.msk.bf16.gmra.mrb[4].mxu0 %vm672_vm11, %v1673_v29  ;;  %vm605_vm15 = vcmp.le.f32.partialorder %v2257_v44, %v2222_v40 }
 0x120   : > { %vm673_vm4 = vmpackc.even %vm672_vm11, %vm2664_vm5 }
 0x121   : > { %v683_v62 = vsel %vm673_vm4, 16843009, %v1670_v0  ;;  %vm427_vm3 = vmand %vm371_vm14, %vm411_vm1  ;;  %vm637_vm1 = vcmp.lt.f32.partialorder %v2222_v40, %v2303_v50 }
 0x122   : > { %687 = vst [vmem:[%s2353_s15] sm:$0xff] %v683_v62  ;;  %vm431_vm9 = vmand %vm375_vm2, %vm415_vm0 }
 0x123   : > { %vm530_vm11 = vmand %vm482_vm8, %vm514_vm13  ;;  %vm2665_vm13 = vnez %v2635_v43 }
 0x124   : > { %vm534_vm6 = vmand %vm486_vm10, %vm518_vm7  ;;  %vm2666_vm7 = vnez %v2633_v42 }
 0x125   : > { %vm546_vm5 = vmand %vm427_vm3, %vm530_vm11 }
 0x126   : > { %vm550_vm14 = vmand %vm431_vm9, %vm534_vm6 }
 0x127   : > { %vm653_vm4 = vmand %vm605_vm15, %vm637_vm1 }
 0x128   : > { %vm665_vm2 = vmand %vm546_vm5, %vm2424_vm12 }
 0x129   : > { %vm669_vm0 = vmand %vm550_vm14, %vm653_vm4 }
 0x12a   : > { %vm678_vm8 = vmpackc.low %vm669_vm0, %vm665_vm2 }
 0x12b   : > { %vm2667_vm10 = vmpackc.low %vm2665_vm13, %vm2666_vm7  ;;  %1336 = vmatmul.mubr.msk.bf16.gmra.mrb[4].mxu1 %vm678_vm8, %v1673_v29 }
 0x12c   : > { %vm679_vm3 = vmpackc.even %vm678_vm8, %vm2667_vm10 }
 0x12d   : > { %v685_v52 = vsel %vm679_vm3, 16843009, %v1670_v0 }
 0x12e   : > { %689 = vst [vmem:[%s2353_s15 + $0x10] sm:$0xff] %v685_v52 }
 0x12f   : > { %1564 = shalt.err (!%p1561_p4)
}
 0x130   : > { %s1565_s9 = scalar_lea.hbm %s2474_s10, 512  ;;  %s1569_s27 = scalar_lea.hbm %s2557_s4, 1024 }
 0x131   : > { %p1566_p7 = scmp.ne.s32.totalorder %s2474_s10, %s1565_s9  ;;  %p1570_p1 = scmp.lt.u32.totalorder %s2474_s10, %s2557_s4 }
 0x132   : > { %p1571_p3 = scmp.lt.u32.totalorder %s1569_s27, %s1565_s9  ;;  %p1573_p9 = scmp.lt.u32.totalorder %s1565_s9, %s2474_s10 }
 0x133   : > { %p1567_p10 = pnand %p1566_p7, %p2668_p11 }
 0x134   : > { %p1572_p8 = por %p1571_p3, %p1570_p1 }
 0x135   : > { %p1568_p12 = pneg %p1567_p10 }
 0x136   : > { %p1574_p0 = por %p1573_p9, %p1572_p8 }
 0x138   : > { %p1575_p6 = pnand %p1574_p0, %p1568_p12 }
 0x13a   : > { %1578 = shalt.err (!%p1575_p6)
}
 0x13b   : > { %1406 = dma.vmem_to_hbm [thread:$0]  (%p2668_p11), %s1119_s14, 512, %s2474_s10, %s1098_s16  }
 0x13c   : > { %s291_s17 = scalar_lea.vmem [#allocation6], %s1267_s13  ;;  %s2502_s16 = scalar_lea.hbm %s2558_s5, %s1346_s25 }
 0x13d   : > { %s1131_s10 = sshll.u32 %s291_s17, 4  ;;  %s1103_s11 = scalar_lea.sflag [#allocation7], %s1820_s29  ;;  %s2504_s10 = int_to_ptr.vmem [resolvable:$true] %s1131_s10 }
 0x13e   : > { %s1579_s30 = scalar_lea.vmem %s2504_s10, 512  ;;  %s1675_s9 = smov [#allocation6]  }
 0x13f   : > { %p1580_p13 = scmp.ne.s32.totalorder %s2504_s10, %s1579_s30  ;;  %s1583_s21 = sshll.u32 %s1675_s9, 4  ;;  %s1584_s21 = int_to_ptr.vmem [resolvable:$false] %s1583_s21 }
 0x140   : > { %s1585_s12 = scalar_lea.vmem %s1584_s21, 1024  ;;  %p1586_p4 = scmp.lt.s32.totalorder %s2504_s10, %s1584_s21 }
 0x141   : > { %p1581_p2 = pnand %p1580_p13, %p2668_p11  ;;  %p1587_p7 = scmp.lt.s32.totalorder %s1585_s12, %s1579_s30 }
 0x143   : > { %p1582_p5 = pneg %p1581_p2  ;;  %p1588_p10 = por %p1587_p7, %p1586_p4 }
 0x145   : > { %p1589_p12 = pnand %p1588_p10, %p1582_p5 }
 0x1c3   : > { %v1364_v0 = vpop.f32.mrb[0].mxu0 }
 0x1c4   : > { %v1365_v56 = vpop.f32.mrb[1].mxu0 }
 0x1c5   : > { %v1366_v63 = vadd.f32 %v1365_v56, %v1364_v0  ;;  %v1367_v1 = vpop.f32.mrb[2].mxu0 }
 0x1c6   : > { %v1368_v2 = vpop.f32.mrb[3].mxu0 }
 0x1c7   : > { %v1369_v3 = vadd.f32 %v1368_v2, %v1367_v1 }
 0x1cc   : > { %v1392_v4 = vpop.f32.mrb[0].mxu1 }
 0x1cd   : > { %v1393_v5 = vpop.f32.mrb[1].mxu1 }
 0x1ce   : > { %v1394_v6 = vadd.f32 %v1393_v5, %v1392_v4  ;;  %v1395_v7 = vpop.f32.mrb[2].mxu1 }
 0x1cf   : > { %v1396_v8 = vpop.f32.mrb[3].mxu1 }
 0x1d0   : > { %v1075_v9 = vadd.f32 %v1394_v6, %v1366_v63  ;;  %v1397_v10 = vadd.f32 %v1396_v8, %v1395_v7 }
 0x1d2   : > { %v1078_v11 = vadd.f32 %v1397_v10, %v1369_v3  ;;  %1093 = vst [vmem:[%s291_s17] sm:$0xff] %v1075_v9 }
 0x1d4   : > { %1094 = vst [vmem:[%s291_s17 + $0x8] sm:$0xff] %v1078_v11 }
 0x1f2   : > { %v1370_v12 = vpop.f32.mrb[4].mxu0 }
 0x1f3   : > { %v1371_v13 = vpop.f32.mrb[5].mxu0 }
 0x1f4   : > { %v1372_v14 = vadd.f32 %v1371_v13, %v1370_v12  ;;  %v1373_v15 = vpop.f32.mrb[6].mxu0 }
 0x1f5   : > { %v1374_v16 = vpop.f32.mrb[7].mxu0 }
 0x1f6   : > { %v1375_v17 = vadd.f32 %v1374_v16, %v1373_v15 }
 0x1fe   : > { %v1398_v18 = vpop.f32.mrb[4].mxu1 }
 0x1ff   : > { %v1399_v19 = vpop.f32.mrb[5].mxu1 }
 0x200   : > { %v1400_v20 = vadd.f32 %v1399_v19, %v1398_v18  ;;  %v1401_v21 = vpop.f32.mrb[6].mxu1 }
 0x201   : > { %v1402_v22 = vpop.f32.mrb[7].mxu1 }
 0x202   : > { %v1083_v23 = vadd.f32 %v1400_v20, %v1372_v14  ;;  %v1403_v24 = vadd.f32 %v1402_v22, %v1401_v21 }
 0x204   : > { %v1086_v25 = vadd.f32 %v1403_v24, %v1375_v17  ;;  %1095 = vst [vmem:[%s291_s17 + $0x10] sm:$0xff] %v1083_v23 }
 0x206   : > { %1096 = vst [vmem:[%s291_s17 + $0x18] sm:$0xff] %v1086_v25 }
 0x207   : > { %1592 = shalt.err (!%p1589_p12)
}
 0x208   : > { %s1593_s25 = scalar_lea.hbm %s2502_s16, 512  ;;  %s1597_s28 = scalar_lea.hbm %s2558_s5, 1024 }
 0x209   : > { %p1594_p1 = scmp.ne.s32.totalorder %s2502_s16, %s1593_s25  ;;  %p1598_p9 = scmp.lt.u32.totalorder %s2502_s16, %s2558_s5 }
 0x20a   : > { %p1599_p0 = scmp.lt.u32.totalorder %s1597_s28, %s1593_s25  ;;  %p1601_p13 = scmp.lt.u32.totalorder %s1593_s25, %s2502_s16 }
 0x20b   : > { %p1595_p3 = pnand %p1594_p1, %p2668_p11 }
 0x20c   : > { %p1600_p6 = por %p1599_p0, %p1598_p9 }
 0x20d   : > { %p1596_p8 = pneg %p1595_p3 }
 0x20e   : > { %p1602_p2 = por %p1601_p13, %p1600_p6 }
 0x210   : > { %p1603_p5 = pnand %p1602_p2, %p1596_p8 }
 0x212   : > { %1606 = shalt.err (!%p1603_p5)
}
 0x213   : > { %s1676_s13 = smov 128   ;;  %s1677_s14 = smov 8  }
 0x214   : > { %1407 = dma.vmem_to_hbm [thread:$0]  (%p2668_p11), %s2504_s10, 512, %s2502_s16, %s1103_s11, %s1676_s13, %s1676_s13, %s1677_s14  }
 0x215 PF: > { %s1146_s30 = sand.u32 1, %s1645_s18   ;;  %p2669_p4 = scmp.ne.s32.totalorder %s2579_s8, 0 }
 0x216   : > { %p2670_p7 = scmp.ge.s32.totalorder %s1665_s23, 2  ;;  %s1147_s9 = scalar_lea.sflag [#allocation4], %s1146_s30 }
 0x218   : > { %p1415_p10 = pnand %p2670_p7, %p2669_p4 }
 0x21a   : > { %1636 = dma.done.wait (!%p1415_p10), %s1147_s9, 512  }
 0x21b   : > { %1638 = vsyncadd (!%p1415_p10), %s1147_s9, 4294966784  ;;  %s1156_s21 = scalar_lea.sflag [#allocation7], %s1146_s30 }
 0x21c   : > { %1640 = dma.done.wait (!%p1415_p10), %s1156_s21, 512  }
 0x21d   : > { %1642 = vsyncadd (!%p1415_p10), %s1156_s21, 4294966784  ;;  %s25_s23 = sadd.s32 1, %s1665_s23   ;;  %s2671_s18 = smov %s1649_s19 }
 0x21e   : > { %p22_p12 = scmp.ge.s32.totalorder %s25_s23, 4   ;;  %s2672_s19 = smov %s1653_s20 }
 0x21f   : > { %s2673_s20 = smov %s1764_s7  ;;  %s2674_s21 = smov %s1661_s22 }
 0x220   : > { %s2675_s22 = smov %s2677_s26  ;;  %24 = sbr.rel (!%p22_p12) target bundleno = 8 (0x8), region = 107 }
 0x227   :  { %1161 = vsyncpa [#allocation3], 1 }
 0x228   :  { %1163 = vsyncpa [#allocation3 + $0x1], 1 }
 0x229   :  { %1164 = vsyncpa [#allocation4], 1 }
 0x22a   :  { %1166 = vsyncpa [#allocation4 + $0x1], 1 }
 0x22b   :  { %1167 = vsyncpa [#allocation7], 1 }
 0x22c   :  { %1169 = vsyncpa [#allocation7 + $0x1], 1 }

</bundles_post_ra>
